<compile_context>
chip_gen: v6e
topology: v6e:2x2x1
jax: 0.10.0
libtpu: 0.0.40
codegen_flags: <defaults>
</compile_context>

<pallas_src>
import functools

import jax
import jax.numpy as jnp
from jax.experimental import pallas as pl
from jax.experimental.pallas import tpu as pltpu

P_DROP = 0.5
N_DROPOUTS = 5
_LANE = 128
_MAX_TILE_ROWS = 1024  # 1024 * 128 * 4 B = 512 KiB per f32 tile


def _soft_dropout_p50_kernel(x_ref, bits_ref, o_ref, *, n, scale):
    """p == 0.5 fast path: each of the n masks is one bit of a single uint32 draw."""
    bits = bits_ref[...]                                   # (tile_r, lane) uint32
    count = bits & jnp.uint32(1)
    for k in range(1, n):                                  # short fixed trip count, unrolled
        count = count + ((bits >> jnp.uint32(k)) & jnp.uint32(1))
    x = x_ref[...].astype(jnp.float32)
    # scale = keep_scale / (n * numel) folded into one compile-time constant.
    o_ref[...] = (x * (count.astype(jnp.float32) * scale)).astype(o_ref.dtype)


def _soft_dropout_general_kernel(x_ref, bits_ref, o_ref, *, p, scale):
    """General-p path: integer-domain threshold on n independent uint32 planes."""
    thresh = jnp.uint32(min(int(p * (1 << 32)), (1 << 32) - 1))
    bits = bits_ref[...]                                   # (n, tile_r, lane) uint32
    keep = (bits >= thresh).astype(jnp.float32)            # keep w.p. (1 - p)
    count = jnp.sum(keep, axis=0)                          # (tile_r, lane)
    x = x_ref[...].astype(jnp.float32)
    o_ref[...] = (x * (count * scale)).astype(o_ref.dtype)


def soft_dropout(x, key, *, p=P_DROP, n=N_DROPOUTS):
    """x: any-shape float array (e.g. NCHW). key: jax PRNG key. Returns same shape/dtype."""
    orig_shape = x.shape
    orig_dtype = x.dtype
    numel = x.size
    # keep_scale / numel(stacked outputs) == (1/(1-p)) / (n * x.numel())
    scale = (1.0 / (1.0 - p)) / float(n * numel)

    # Flatten to a lane-dense (rows, 128) slab; pad only if numel % 128 != 0.
    rows = pl.cdiv(numel, _LANE)
    padded = rows * _LANE
    x_flat = jnp.ravel(x)
    if padded != numel:
        x_flat = jnp.pad(x_flat, (0, padded - numel))
    x2d = x_flat.reshape(rows, _LANE)

    tile_r = min(rows, _MAX_TILE_ROWS)
    grid = (pl.cdiv(rows, tile_r),)
    tile_spec = pl.BlockSpec((tile_r, _LANE), lambda i: (i, 0))

    if p == 0.5 and 1 <= n <= 32:
        # One uint32 per element; low n bits are the n Bernoulli(0.5) keep events.
        bits = jax.random.bits(key, (rows, _LANE), dtype=jnp.uint32)
        kernel = functools.partial(_soft_dropout_p50_kernel, n=n, scale=scale)
        bits_spec = tile_spec
    else:
        # n independent uint32 planes per element, thresholded in the integer domain.
        bits = jax.random.bits(key, (n, rows, _LANE), dtype=jnp.uint32)
        kernel = functools.partial(_soft_dropout_general_kernel, p=p, scale=scale)
        bits_spec = pl.BlockSpec((n, tile_r, _LANE), lambda i: (0, i, 0))

    out2d = pl.pallas_call(
        kernel,
        out_shape=jax.ShapeDtypeStruct((rows, _LANE), orig_dtype),
        grid=grid,
        in_specs=[tile_spec, bits_spec],
        out_specs=tile_spec,
        compiler_params=pltpu.CompilerParams(
            dimension_semantics=("parallel",)),
    )(x2d, bits)

    out_flat = out2d.reshape(-1)
    if padded != numel:
        out_flat = out_flat[:numel]
    return out_flat.reshape(orig_shape)


if __name__ == "__main__":
    key = jax.random.PRNGKey(0)
    x_key, drop_key = jax.random.split(key)
    x = jax.random.normal(x_key, (2, 4, 16, 16), dtype=jnp.float32)  # NCHW

    out = soft_dropout(x, drop_key)
    out = jax.block_until_ready(out)

    # sanity: shape/dtype preserved, finite, and every element is x * k * 2/(5*numel)
    # for some integer k in [0, 5] (k = number of masks that kept the element).
    assert out.shape == x.shape and out.dtype == x.dtype
    assert bool(jnp.all(jnp.isfinite(out)))

    numel = x.size
    scale = (1.0 / (1.0 - P_DROP)) / float(N_DROPOUTS * numel)
    safe_x = jnp.where(x == 0, 1.0, x)
    ratio = out / safe_x / scale                 # should be ~integer count in [0, n]
    k = jnp.round(ratio)
    assert bool(jnp.all(jnp.abs(ratio - k) < 1e-2))
    assert bool(jnp.all((k >= 0) & (k <= N_DROPOUTS)))

    print("KERNEL_OK")
</pallas_src>

<mosaic_0001>
module attributes {stable_mosaic.version = 11 : i64} {
  func.func @_soft_dropout_p50_kernel(%arg0: i32, %arg1: memref<16x128xf32, #tpu.memory_space<vmem>>, %arg2: memref<16x128xi32, #tpu.memory_space<vmem>>, %arg3: memref<16x128xf32, #tpu.memory_space<vmem>>) attributes {dimension_semantics = [#tpu.dimension_semantics<parallel>], iteration_bounds = array<i64: 1>, scalar_prefetch = 0 : i64, scratch_operands = 0 : i64, tpu.core_type = #tpu.core_type<tc>, window_params = [{transform_indices = @transform_0, window_bounds = array<i64: 16, 128>}, {transform_indices = @transform_1, window_bounds = array<i64: 16, 128>}, {transform_indices = @transform_2, window_bounds = array<i64: 16, 128>}]} {
    %c0 = arith.constant 0 : index
    %c0_0 = arith.constant 0 : index
    %0 = vector.load %arg2[%c0, %c0_0] : memref<16x128xi32, #tpu.memory_space<vmem>>, vector<16x128xi32>
    %c1_i32 = arith.constant 1 : i32
    %1 = vector.broadcast %c1_i32 : i32 to vector<16x128xi32>
    %2 = arith.andi %0, %1 : vector<16x128xi32>
    %c1_i32_1 = arith.constant 1 : i32
    %3 = vector.broadcast %c1_i32_1 : i32 to vector<16x128xi32>
    %4 = arith.shrui %0, %3 : vector<16x128xi32>
    %c1_i32_2 = arith.constant 1 : i32
    %5 = vector.broadcast %c1_i32_2 : i32 to vector<16x128xi32>
    %6 = arith.andi %4, %5 : vector<16x128xi32>
    %7 = arith.addi %2, %6 : vector<16x128xi32>
    %c2_i32 = arith.constant 2 : i32
    %8 = vector.broadcast %c2_i32 : i32 to vector<16x128xi32>
    %9 = arith.shrui %0, %8 : vector<16x128xi32>
    %c1_i32_3 = arith.constant 1 : i32
    %10 = vector.broadcast %c1_i32_3 : i32 to vector<16x128xi32>
    %11 = arith.andi %9, %10 : vector<16x128xi32>
    %12 = arith.addi %7, %11 : vector<16x128xi32>
    %c3_i32 = arith.constant 3 : i32
    %13 = vector.broadcast %c3_i32 : i32 to vector<16x128xi32>
    %14 = arith.shrui %0, %13 : vector<16x128xi32>
    %c1_i32_4 = arith.constant 1 : i32
    %15 = vector.broadcast %c1_i32_4 : i32 to vector<16x128xi32>
    %16 = arith.andi %14, %15 : vector<16x128xi32>
    %17 = arith.addi %12, %16 : vector<16x128xi32>
    %c4_i32 = arith.constant 4 : i32
    %18 = vector.broadcast %c4_i32 : i32 to vector<16x128xi32>
    %19 = arith.shrui %0, %18 : vector<16x128xi32>
    %c1_i32_5 = arith.constant 1 : i32
    %20 = vector.broadcast %c1_i32_5 : i32 to vector<16x128xi32>
    %21 = arith.andi %19, %20 : vector<16x128xi32>
    %22 = arith.addi %17, %21 : vector<16x128xi32>
    %c0_6 = arith.constant 0 : index
    %c0_7 = arith.constant 0 : index
    %23 = vector.load %arg1[%c0_6, %c0_7] : memref<16x128xf32, #tpu.memory_space<vmem>>, vector<16x128xf32>
    %24 = arith.uitofp %22 : vector<16x128xi32> to vector<16x128xf32>
    %cst = arith.constant 1.95312503E-4 : f32
    %25 = vector.broadcast %cst : f32 to vector<16x128xf32>
    %26 = arith.mulf %24, %25 : vector<16x128xf32>
    %27 = arith.mulf %23, %26 : vector<16x128xf32>
    %c0_8 = arith.constant 0 : index
    %c0_9 = arith.constant 0 : index
    %28 = vector.load %arg3[%c0_8, %c0_9] : memref<16x128xf32, #tpu.memory_space<vmem>>, vector<16x128xf32>
    tpu.vector_store %arg3[%c0_8, %c0_9], %27 {strides = array<i32>} : memref<16x128xf32, #tpu.memory_space<vmem>>, vector<16x128xf32>,
    return
  }
  func.func @transform_0(%arg0: i32) -> (i32, i32) {
    %c0_i32 = arith.constant 0 : i32
    %c0_i32_0 = arith.constant 0 : i32
    return %arg0, %c0_i32 : i32, i32
  }
  func.func @transform_1(%arg0: i32) -> (i32, i32) {
    %c0_i32 = arith.constant 0 : i32
    %c0_i32_0 = arith.constant 0 : i32
    return %arg0, %c0_i32 : i32, i32
  }
  func.func @transform_2(%arg0: i32) -> (i32, i32) {
    %c0_i32 = arith.constant 0 : i32
    %c0_i32_0 = arith.constant 0 : i32
    return %arg0, %c0_i32 : i32, i32
  }
}

</mosaic_0001>

<bundles_post_ra>
// kernel: tpu_custom_call.1
= control target key start
LH: loop header
LB: loop body
LE: loop exit
PB: predicated region body
PF: predicated region fallthrough
CT: control target
= control target key end

     0   :  { %7 = vsyncpa [#allocation3], 0  ;;  %s215_s0 = inlined_call_operand.hbm [shape: f32[16,128], index: 0, kind: input, shape index: {}]   ;;  %s216_s1 = inlined_call_operand.hbm [shape: u32[16,128], index: 1, kind: input, shape index: {}]   ;;  %s217_s2 = inlined_call_operand.hbm [shape: f32[16,128], index: 2, kind: output, shape index: {}]  }
   0x1   :  { %8 = vsyncpa [#allocation6], 0 }
   0x2   :  { %9 = vsyncpa [#allocation4], 0  ;;  %s177_s9 = smov [#allocation2]  }
   0x3   :  { %s15_s10 = sshll.u32 %s177_s9, 4  ;;  %s16_s10 = int_to_ptr.vmem [resolvable:$true] %s15_s10 }
   0x4   :  { %s119_s11 = scalar_lea.vmem %s16_s10, 256  ;;  %p124_p1 = scmp.lt.s32.totalorder %s16_s10, %s16_s10 }
   0x5   :  { %p120_p0 = scmp.ne.s32.totalorder %s16_s10, %s119_s11  ;;  %p125_p2 = scmp.lt.s32.totalorder %s119_s11, %s119_s11 }
   0x7   :  { %p126_p3 = por %p125_p2, %p124_p1 }
   0x9   :  { %p127_p4 = pnand %p126_p3, %p120_p0 }
   0xb   :  { %130 = shalt.err (!%p127_p4)
}
   0xc   :  { %s178_s12 = smov 128   ;;  %s179_s13 = smov 8  }
   0xd   :  { %21 = dma.hbm_to_vmem [thread:$0]  %s215_s0, 256, %s16_s10, [#allocation3], %s178_s12, %s178_s12, %s179_s13  }
   0xe   :  { %s180_s16 = smov [#allocation5]  }
   0xf   :  { %s27_s17 = sshll.u32 %s180_s16, 4  ;;  %s28_s17 = int_to_ptr.vmem [resolvable:$true] %s27_s17 }
  0x10   :  { %s139_s18 = scalar_lea.vmem %s28_s17, 256  ;;  %p144_p6 = scmp.lt.s32.totalorder %s28_s17, %s28_s17 }
  0x11   :  { %p140_p5 = scmp.ne.s32.totalorder %s28_s17, %s139_s18  ;;  %p145_p7 = scmp.lt.s32.totalorder %s139_s18, %s139_s18 }
  0x13   :  { %p146_p8 = por %p145_p7, %p144_p6 }
  0x15   :  { %p147_p9 = pnand %p146_p8, %p140_p5 }
  0x17   :  { %150 = shalt.err (!%p147_p9)
}
  0x18   :  { %33 = dma.hbm_to_vmem [thread:$0]  %s216_s1, 256, %s28_s17, [#allocation6], %s178_s12, %s178_s12, %s179_s13  }
  0x19   :  { %171 = dma.done.wait [#allocation3], 256  }
  0x1a   :  { %172 = vsyncadd [#allocation3], 4294967040 }
  0x1b   :  { %173 = dma.done.wait [#allocation6], 256  }
  0x1c   :  { %174 = vsyncadd [#allocation6], 4294967040  ;;  %v40_v0 = vld [vmem:[#allocation5] sm:$0xff]  ;;  %v41_v1 = vld [vmem:[#allocation5 + $0x8] sm:$0xff]  ;;  %s181_s0 = smov [#allocation7]  }
  0x1d   :  { %v42_v2 = vand.u32 1, %v40_v0  ;;  %v44_v3 = vshrl.u32 %v40_v0, 1  ;;  %v50_v4 = vshrl.u32 %v40_v0, 2  ;;  %v56_v5 = vshrl.u32 %v40_v0, 3  ;;  %v68_v39 = vld [vmem:[#allocation2] sm:$0xff]  ;;  %v69_v42 = vld [vmem:[#allocation2 + $0x8] sm:$0xff] }
  0x1e   :  { %v43_v6 = vand.u32 1, %v41_v1  ;;  %v45_v7 = vshrl.u32 %v41_v1, 1  ;;  %v51_v8 = vshrl.u32 %v41_v1, 2  ;;  %v62_v11 = vshrl.u32 %v40_v0, 4  ;;  %s93_s1 = sshll.u32 %s181_s0, 4  ;;  %s94_s1 = int_to_ptr.vmem [resolvable:$true] %s93_s1 }
  0x1f   :  { %v46_v9 = vand.u32 1, %v44_v3  ;;  %v52_v10 = vand.u32 1, %v50_v4  ;;  %v57_v12 = vshrl.u32 %v41_v1, 3  ;;  %v63_v15 = vshrl.u32 %v41_v1, 4  ;;  %s151_s21 = scalar_lea.vmem %s94_s1, 256  ;;  %p156_p11 = scmp.lt.s32.totalorder %s94_s1, %s94_s1 }
  0x20   :  { %v47_v13 = vand.u32 1, %v45_v7  ;;  %v53_v14 = vand.u32 1, %v51_v8  ;;  %v58_v17 = vand.u32 1, %v56_v5  ;;  %v64_v21 = vand.u32 1, %v62_v11  ;;  %p152_p10 = scmp.ne.s32.totalorder %s94_s1, %s151_s21  ;;  %p157_p12 = scmp.lt.s32.totalorder %s151_s21, %s151_s21 }
  0x21   :  { %v48_v16 = vadd.s32 %v46_v9, %v42_v2  ;;  %v59_v19 = vand.u32 1, %v57_v12  ;;  %v65_v23 = vand.u32 1, %v63_v15 }
  0x22   :  { %v49_v18 = vadd.s32 %v47_v13, %v43_v6  ;;  %p158_p13 = por %p157_p12, %p156_p11 }
  0x23   :  { %v54_v20 = vadd.s32 %v52_v10, %v48_v16 }
  0x24   :  { %v55_v22 = vadd.s32 %v53_v14, %v49_v18  ;;  %p159_p0 = pnand %p158_p13, %p152_p10 }
  0x25   :  { %v60_v24 = vadd.s32 %v58_v17, %v54_v20 }
  0x26   :  { %v61_v25 = vadd.s32 %v59_v19, %v55_v22 }
  0x27   :  { %v66_v26 = vadd.s32 %v64_v21, %v60_v24 }
  0x28   :  { %v67_v27 = vadd.s32 %v65_v23, %v61_v25 }
  0x29   :  { %v70_v28 = vshrl.u32 %v66_v26, 16  ;;  %v71_v29 = vand.u32 65535, %v66_v26 }
  0x2a   :  { %v76_v30 = vshrl.u32 %v67_v27, 16  ;;  %v77_v31 = vand.u32 65535, %v67_v27 }
  0x2b   :  { %v72_v32 = vcvt.s32.f32 %v70_v28  ;;  %v74_v33 = vcvt.s32.f32 %v71_v29 }
  0x2c   :  { %v78_v34 = vcvt.s32.f32 %v76_v30  ;;  %v80_v35 = vcvt.s32.f32 %v77_v31 }
  0x2d   :  { %v73_v36 = vmul.f32 65536.0, %v72_v32 }
  0x2e   :  { %v79_v37 = vmul.f32 65536.0, %v78_v34 }
  0x2f   :  { %v75_v38 = vadd.f32 %v74_v33, %v73_v36 }
  0x30   :  { %v81_v40 = vadd.f32 %v80_v35, %v79_v37 }
  0x31   :  { %v82_v41 = vmul.f32 0.0001953125, %v75_v38 }
  0x32   :  { %v83_v43 = vmul.f32 0.0001953125, %v81_v40 }
  0x33   :  { %v84_v44 = vmul.f32 %v82_v41, %v68_v39 }
  0x34   :  { %v85_v45 = vmul.f32 %v83_v43, %v69_v42 }
  0x35   :  { %86 = vst [vmem:[#allocation7] sm:$0xff] %v84_v44 }
  0x36   :  { %87 = vst [vmem:[#allocation7 + $0x8] sm:$0xff] %v85_v45 }
  0x37   :  { %162 = shalt.err (!%p159_p0)
}
  0x38   :  { %99 = dma.vmem_to_hbm [thread:$0]  %s94_s1, 256, %s217_s2, [#allocation4], %s178_s12, %s178_s12, %s179_s13  }
  0x39   :  { %175 = dma.done.wait [#allocation4], 256  }
  0x3a   :  { %176 = vsyncadd [#allocation4], 4294967040 }
  0x3b   :  { %103 = vsyncpa [#allocation3], 1 }
  0x3c   :  { %104 = vsyncpa [#allocation6], 1 }
  0x3d   :  { %105 = vsyncpa [#allocation4], 1 }

</bundles_post_ra>
